<compile_context>
chip_gen: v5e
topology: v5e:2x2
jax: 0.10.0
libtpu: 0.0.40
codegen_flags: <defaults>
</compile_context>

<pallas_src>
import jax
import jax.numpy as jnp
import numpy as np
from jax import lax
from jax.experimental import pallas as pl
from jax.experimental.pallas import tpu as pltpu


def _agg_mix_kernel(lengths_ref, spans_ref,          # SMEM scalar prefetch
                    x_ref, sev_ref,                   # VMEM inputs
                    min_ref, max_ref, mean_ref):      # VMEM outputs
    """One grid step == one (batch element, D-tile).

    lengths_ref : SMEM (B,)           int32
    spans_ref   : SMEM (B, 2*S_pad)   int32  flattened [s0,e0,s1,e1,...]
    x_ref       : VMEM (T, tD)        input dtype (lane-padded feature tile)
    sev_ref     : VMEM (S_pad, 2)     int32  inclusive [start, end] per span
    min_ref/max_ref/mean_ref : VMEM (S_pad, tD) out dtype
    """
    b = pl.program_id(0)
    x = x_ref[...]                                    # (T, tD), stays in input dtype
    T, tD = x.shape
    Sp = sev_ref.shape[0]
    n_spans = lengths_ref[b]

    se = sev_ref[...]                                 # (Sp, 2) int32
    starts = se[:, 0:1]                               # (Sp, 1)
    ends = se[:, 1:2]                                 # (Sp, 1)

    j_iota = lax.broadcasted_iota(jnp.int32, (Sp, 1), 0)
    valid = (j_iota < n_spans) & jnp.logical_not((starts == 0) & (ends == 0))
    # Arithmetic token count clipped to [0, T) -- identical to the mask sum.
    cnt = jnp.minimum(ends, T - 1) - jnp.maximum(starts, 0) + 1
    gate = valid & (cnt > 0)                          # also kills would-be inf rows

    # ---------------- mean: one MXU matmul in the input dtype ----------------
    t_cols = lax.broadcasted_iota(jnp.int32, (Sp, T), 1)
    mask = ((t_cols >= starts) & (t_cols <= ends)).astype(x.dtype)   # (Sp, T)
    sums = jnp.dot(mask, x, preferred_element_type=jnp.float32)      # (Sp, tD) f32
    scale = jnp.where(gate, 1.0 / jnp.maximum(cnt.astype(jnp.float32), 1.0), 0.0)
    mean_ref[...] = (sums * scale).astype(mean_ref.dtype)

    # ------- min / max: 8 spans per block, token loop over union window -------
    pos_inf = jnp.full((8, tD), jnp.inf, dtype=x.dtype)
    neg_inf = jnp.full((8, tD), -jnp.inf, dtype=x.dtype)

    def blk(kb, carry):
        j0 = pl.multiple_of(kb * 8, 8)
        se8 = sev_ref[pl.ds(j0, 8), :]                # (8, 2)
        s8 = se8[:, 0:1]
        e8 = se8[:, 1:2]
        jv = j0 + lax.broadcasted_iota(jnp.int32, (8, 1), 0)
        valid8 = (jv < n_spans) & jnp.logical_not((s8 == 0) & (e8 == 0))
        cnt8 = jnp.minimum(e8, T - 1) - jnp.maximum(s8, 0) + 1
        gate8 = valid8 & (cnt8 > 0)

        # Scalar-unit union window over the 8 spans (cheap SMEM reads; all-invalid
        # block -> empty window -> zero-trip loop -> zeros stored).
        t_lo = jnp.int32(T)
        t_hi = jnp.int32(-1)
        for s in range(8):                            # static unroll, scalar path
            j = j0 + s
            ii = spans_ref[b, 2 * j]
            jj = spans_ref[b, 2 * j + 1]
            ok = (j < n_spans) & jnp.logical_not((ii == 0) & (jj == 0))
            t_lo = jnp.minimum(t_lo, jnp.where(ok, ii, T))
            t_hi = jnp.maximum(t_hi, jnp.where(ok, jnp.minimum(jj, T - 1), -1))
        t_lo = jnp.maximum(t_lo, 0)

        def token_body(t, accs):
            amn, amx = accs
            row = x_ref[pl.ds(t, 1), :]               # (1, tD), broadcasts over 8 spans
            in_span = (t >= s8) & (t <= e8)           # (8, 1)
            amn = jnp.where(in_span, jnp.minimum(amn, row), amn)
            amx = jnp.where(in_span, jnp.maximum(amx, row), amx)
            return amn, amx

        amn, amx = lax.fori_loop(t_lo, t_hi + 1, token_body, (pos_inf, neg_inf))
        min_ref[pl.ds(j0, 8), :] = jnp.where(gate8, amn, 0).astype(min_ref.dtype)
        max_ref[pl.ds(j0, 8), :] = jnp.where(gate8, amx, 0).astype(max_ref.dtype)
        return carry

    lax.fori_loop(0, Sp // 8, blk, 0, unroll=True)


def _pick_tile_d(d_pad, tile_d):
    """Largest multiple of 128 <= tile_d that divides d_pad."""
    k_total = d_pad // 128
    k_max = max(1, min(tile_d // 128, k_total))
    for k in range(k_max, 0, -1):
        if k_total % k == 0:
            return 128 * k
    return 128


def agg_mix(x, lengths, span_idxs, *, num_spans=None, tile_d=512, out_dtype=None):
    """Pallas wrapper reproducing Agg(mode='mix').forward(x, lengths, span_idxs).

    `num_spans` is a static bound on the output span dimension (defaults to the
    span capacity span_idxs.shape[1]); no device->host sync, one compile.
    Outputs default to x.dtype (halves writeback for bf16 activations).
    """
    B, T, D = x.shape
    S_cap = span_idxs.shape[1]
    if num_spans is None:
        num_spans = S_cap
    if out_dtype is None:
        out_dtype = x.dtype

    lengths = lengths.astype(jnp.int32)
    span_idxs = span_idxs.astype(jnp.int32)

    S_pad = ((S_cap + 7) // 8) * 8            # sublane-dense span blocks
    D_pad = ((D + 127) // 128) * 128          # lane-dense feature dim
    tD = _pick_tile_d(D_pad, tile_d)
    nD = D_pad // tD
    num_spans = min(num_spans, S_pad)

    x_p = jnp.pad(x, ((0, 0), (0, 0), (0, D_pad - D))) if D_pad != D else x
    sev = (jnp.pad(span_idxs, ((0, 0), (0, S_pad - S_cap), (0, 0)))
           if S_pad != S_cap else span_idxs)                  # (B, S_pad, 2)
    spans_flat = sev.reshape(B, 2 * S_pad)                    # SMEM-friendly layout

    # Explicit VMEM budget: double-buffered x / sev / 3 outputs + matmul headroom.
    bx = jnp.dtype(x.dtype).itemsize
    bo = jnp.dtype(out_dtype).itemsize
    needed = (2 * T * tD * bx + 2 * S_pad * 128 * 4
              + 3 * 2 * S_pad * tD * bo
              + S_pad * T * 4 + S_pad * tD * 4 + (1 << 20))
    vmem_limit = int(min(128 * (1 << 20), max(32 * (1 << 20), 2 * needed)))

    grid_spec = pltpu.PrefetchScalarGridSpec(
        num_scalar_prefetch=2,                # lengths, spans_flat -> SMEM
        grid=(B, nD),
        in_specs=[
            pl.BlockSpec((None, T, tD), lambda b, d, lens, spans: (b, 0, d)),
            pl.BlockSpec((None, S_pad, 2), lambda b, d, lens, spans: (b, 0, 0)),
        ],
        out_specs=[
            pl.BlockSpec((None, S_pad, tD), lambda b, d, lens, spans: (b, 0, d)),
            pl.BlockSpec((None, S_pad, tD), lambda b, d, lens, spans: (b, 0, d)),
            pl.BlockSpec((None, S_pad, tD), lambda b, d, lens, spans: (b, 0, d)),
        ],
    )

    out_sds = jax.ShapeDtypeStruct((B, S_pad, D_pad), out_dtype)
    mins, maxs, means = pl.pallas_call(
        _agg_mix_kernel,
        out_shape=(out_sds, out_sds, out_sds),
        grid_spec=grid_spec,
        compiler_params=pltpu.CompilerParams(
            dimension_semantics=("parallel", "parallel"),
            vmem_limit_bytes=vmem_limit),
    )(lengths, spans_flat, x_p, sev)

    # TODO(synk): when D % 128 == 0 and nD == 1 the three stores could target a
    # single fused (B, S_pad, 3*D_pad) output at lane offsets 0/D_pad/2*D_pad and
    # drop this concat (one fewer HBM pass); kept one code path since D-tiled
    # fused stores would require dynamic lane offsets.
    return jnp.concatenate(
        [mins[:, :num_spans, :D], maxs[:, :num_spans, :D], means[:, :num_spans, :D]],
        axis=-1)


def agg_mix_reference(x, lengths, span_idxs, S):
    """NumPy port of the PyTorch forward (mode='mix') for validation."""
    x = np.asarray(x)
    lengths = np.asarray(lengths)
    span_idxs = np.asarray(span_idxs)
    B, T, D = x.shape
    out = np.zeros((B, S, 3 * D), np.float32)
    for i in range(B):
        for j in range(int(lengths[i])):
            ii, jj = int(span_idxs[i, j, 0]), int(span_idxs[i, j, 1])
            if ii == 0 and jj == 0:
                continue
            seg = x[i, ii:jj + 1]
            out[i, j] = np.concatenate([seg.min(0), seg.max(0), seg.mean(0)])
    return out


if __name__ == "__main__":
    key = jax.random.PRNGKey(0)
    B, T, D = 2, 16, 32          # batch, seq_len, input_size

    x = jax.random.normal(key, (B, T, D), dtype=jnp.float32)
    lengths = jnp.array([5, 3], dtype=jnp.int32)
    span_idxs = jnp.array(
        [
            [[0, 2], [3, 5], [0, 0], [6, 9], [10, 15]],   # (0,0) span -> zero row
            [[1, 4], [5, 10], [11, 15], [0, 0], [0, 0]],  # last two are padding
        ],
        dtype=jnp.int32,
    )
    NUM_SPANS = 5                # static bound == max(lengths) for this test data

    out = agg_mix(x, lengths, span_idxs, num_spans=NUM_SPANS)
    out = jax.block_until_ready(out)

    ref = agg_mix_reference(x, lengths, span_idxs, NUM_SPANS)
    np.testing.assert_allclose(np.asarray(out), ref, rtol=1e-5, atol=1e-5)
    print("KERNEL_OK")
</pallas_src>

<mosaic_0001>
module attributes {stable_mosaic.version = 11 : i64} {
  func.func @_agg_mix_kernel(%arg0: i32, %arg1: i32, %arg2: memref<2xi32, #tpu.memory_space<smem>>, %arg3: memref<2x16xi32, #tpu.memory_space<smem>>, %arg4: memref<1x16x128xf32, #tpu.memory_space<vmem>>, %arg5: memref<1x8x2xi32, #tpu.memory_space<vmem>>, %arg6: memref<1x8x128xf32, #tpu.memory_space<vmem>>, %arg7: memref<1x8x128xf32, #tpu.memory_space<vmem>>, %arg8: memref<1x8x128xf32, #tpu.memory_space<vmem>>) attributes {dimension_semantics = [#tpu.dimension_semantics<parallel>, #tpu.dimension_semantics<parallel>], iteration_bounds = array<i64: 2, 1>, scalar_prefetch = 2 : i64, scratch_operands = 0 : i64, tpu.core_type = #tpu.core_type<tc>, window_params = [{transform_indices = @transform_0, window_bounds = array<i64: 1, 16, 128>}, {transform_indices = @transform_1, window_bounds = array<i64: 1, 8, 2>}, {transform_indices = @transform_2, window_bounds = array<i64: 1, 8, 128>}, {transform_indices = @transform_3, window_bounds = array<i64: 1, 8, 128>}, {transform_indices = @transform_4, window_bounds = array<i64: 1, 8, 128>}]} {
    %c0 = arith.constant 0 : index
    %c0_0 = arith.constant 0 : index
    %c0_1 = arith.constant 0 : index
    %0 = vector.load %arg4[%c0, %c0_0, %c0_1] : memref<1x16x128xf32, #tpu.memory_space<vmem>>, vector<1x16x128xf32>
    %1 = vector.shape_cast %0 : vector<1x16x128xf32> to vector<16x128xf32>
    %2 = arith.index_cast %arg0 : i32 to index
    %3 = memref.load %arg2[%2] : memref<2xi32, #tpu.memory_space<smem>>
    %c0_2 = arith.constant 0 : index
    %c0_3 = arith.constant 0 : index
    %c0_4 = arith.constant 0 : index
    %4 = vector.load %arg5[%c0_2, %c0_3, %c0_4] : memref<1x8x2xi32, #tpu.memory_space<vmem>>, vector<1x8x2xi32>
    %5 = vector.shape_cast %4 : vector<1x8x2xi32> to vector<8x2xi32>
    %6 = vector.extract_strided_slice %5 {offsets = [0, 0], sizes = [8, 1], strides = [1, 1]} : vector<8x2xi32> to vector<8x1xi32>
    %7 = vector.extract_strided_slice %5 {offsets = [0, 1], sizes = [8, 1], strides = [1, 1]} : vector<8x2xi32> to vector<8x1xi32>
    %8 = tpu.iota {dimensions = array<i32: 0>} : vector<8x1xi32>
    %9 = vector.broadcast %3 : i32 to vector<8x1xi32>
    %10 = arith.cmpi slt, %8, %9 : vector<8x1xi32>
    %c0_i32 = arith.constant 0 : i32
    %11 = vector.broadcast %c0_i32 : i32 to vector<8x1xi32>
    %12 = arith.cmpi eq, %6, %11 : vector<8x1xi32>
    %c0_i32_5 = arith.constant 0 : i32
    %13 = vector.broadcast %c0_i32_5 : i32 to vector<8x1xi32>
    %14 = arith.cmpi eq, %7, %13 : vector<8x1xi32>
    %15 = arith.andi %12, %14 : vector<8x1xi1>
    %cst = arith.constant dense<true> : vector<8x1xi1>
    %16 = arith.xori %15, %cst : vector<8x1xi1>
    %17 = arith.andi %10, %16 : vector<8x1xi1>
    %c15_i32 = arith.constant 15 : i32
    %18 = vector.broadcast %c15_i32 : i32 to vector<8x1xi32>
    %19 = arith.minsi %7, %18 : vector<8x1xi32>
    %c0_i32_6 = arith.constant 0 : i32
    %20 = vector.broadcast %c0_i32_6 : i32 to vector<8x1xi32>
    %21 = arith.maxsi %6, %20 : vector<8x1xi32>
    %22 = arith.subi %19, %21 : vector<8x1xi32>
    %c1_i32 = arith.constant 1 : i32
    %23 = vector.broadcast %c1_i32 : i32 to vector<8x1xi32>
    %24 = arith.addi %22, %23 : vector<8x1xi32>
    %c0_i32_7 = arith.constant 0 : i32
    %25 = vector.broadcast %c0_i32_7 : i32 to vector<8x1xi32>
    %26 = arith.cmpi sgt, %24, %25 : vector<8x1xi32>
    %27 = arith.andi %17, %26 : vector<8x1xi1>
    %28 = tpu.iota {dimensions = array<i32: 1>} : vector<8x16xi32>
    %29 = vector.broadcast %6 : vector<8x1xi32> to vector<8x16xi32>
    %30 = arith.cmpi sge, %28, %29 : vector<8x16xi32>
    %31 = vector.broadcast %7 : vector<8x1xi32> to vector<8x16xi32>
    %32 = arith.cmpi sle, %28, %31 : vector<8x16xi32>
    %33 = arith.andi %30, %32 : vector<8x16xi1>
    %34 = arith.extui %33 : vector<8x16xi1> to vector<8x16xi32>
    %35 = arith.sitofp %34 : vector<8x16xi32> to vector<8x16xf32>
    %cst_8 = arith.constant dense<0.000000e+00> : vector<8x128xf32>
    %36 = tpu.matmul %35, %1, %cst_8 {dimension_numbers = #tpu.dot_dimension_numbers<[1], [0], [0], [1], [0, 0, 1, 1], [], []>} : vector<8x16xf32>, vector<16x128xf32>, vector<8x128xf32> -> vector<8x128xf32>
    %37 = arith.sitofp %24 : vector<8x1xi32> to vector<8x1xf32>
    %cst_9 = arith.constant 1.000000e+00 : f32
    %38 = vector.broadcast %cst_9 : f32 to vector<8x1xf32>
    %39 = arith.maximumf %37, %38 : vector<8x1xf32>
    %cst_10 = arith.constant 1.000000e+00 : f32
    %40 = vector.broadcast %cst_10 : f32 to vector<8x1xf32>
    %41 = arith.divf %40, %39 : vector<8x1xf32>
    %cst_11 = arith.constant 0.000000e+00 : f32
    %42 = vector.broadcast %cst_11 : f32 to vector<8x1xf32>
    %43 = arith.select %27, %41, %42 : vector<8x1xi1>, vector<8x1xf32>
    %44 = vector.broadcast %43 : vector<8x1xf32> to vector<8x128xf32>
    %45 = arith.mulf %36, %44 : vector<8x128xf32>
    %c0_12 = arith.constant 0 : index
    %c0_13 = arith.constant 0 : index
    %c0_14 = arith.constant 0 : index
    %46 = vector.load %arg8[%c0_12, %c0_13, %c0_14] : memref<1x8x128xf32, #tpu.memory_space<vmem>>, vector<1x8x128xf32>
    %47 = vector.shape_cast %46 : vector<1x8x128xf32> to vector<8x128xf32>
    %48 = vector.shape_cast %45 : vector<8x128xf32> to vector<1x8x128xf32>
    tpu.vector_store %arg8[%c0_12, %c0_13, %c0_14], %48 {strides = array<i32>} : memref<1x8x128xf32, #tpu.memory_space<vmem>>, vector<1x8x128xf32>,
    %cst_15 = arith.constant 0x7F800000 : f32
    %49 = vector.broadcast %cst_15 : f32 to vector<8x128xf32>
    %cst_16 = arith.constant 0xFF800000 : f32
    %50 = vector.broadcast %cst_16 : f32 to vector<8x128xf32>
    %c0_i32_17 = arith.constant 0 : i32
    %c8_i32 = arith.constant 8 : i32
    %51 = arith.muli %c0_i32_17, %c8_i32 : i32
    %52 = tpu.assume_multiple %51, 8 : i32
    %c0_18 = arith.constant 0 : index
    %53 = arith.index_cast %52 : i32 to index
    %c0_19 = arith.constant 0 : index
    %54 = vector.load %arg5[%c0_18, %53, %c0_19] : memref<1x8x2xi32, #tpu.memory_space<vmem>>, vector<1x8x2xi32>
    %55 = vector.shape_cast %54 : vector<1x8x2xi32> to vector<8x2xi32>
    %56 = vector.extract_strided_slice %55 {offsets = [0, 0], sizes = [8, 1], strides = [1, 1]} : vector<8x2xi32> to vector<8x1xi32>
    %57 = vector.extract_strided_slice %55 {offsets = [0, 1], sizes = [8, 1], strides = [1, 1]} : vector<8x2xi32> to vector<8x1xi32>
    %58 = tpu.iota {dimensions = array<i32: 0>} : vector<8x1xi32>
    %59 = vector.broadcast %52 : i32 to vector<8x1xi32>
    %60 = arith.addi %59, %58 : vector<8x1xi32>
    %61 = vector.broadcast %3 : i32 to vector<8x1xi32>
    %62 = arith.cmpi slt, %60, %61 : vector<8x1xi32>
    %c0_i32_20 = arith.constant 0 : i32
    %63 = vector.broadcast %c0_i32_20 : i32 to vector<8x1xi32>
    %64 = arith.cmpi eq, %56, %63 : vector<8x1xi32>
    %c0_i32_21 = arith.constant 0 : i32
    %65 = vector.broadcast %c0_i32_21 : i32 to vector<8x1xi32>
    %66 = arith.cmpi eq, %57, %65 : vector<8x1xi32>
    %67 = arith.andi %64, %66 : vector<8x1xi1>
    %cst_22 = arith.constant dense<true> : vector<8x1xi1>
    %68 = arith.xori %67, %cst_22 : vector<8x1xi1>
    %69 = arith.andi %62, %68 : vector<8x1xi1>
    %c15_i32_23 = arith.constant 15 : i32
    %70 = vector.broadcast %c15_i32_23 : i32 to vector<8x1xi32>
    %71 = arith.minsi %57, %70 : vector<8x1xi32>
    %c0_i32_24 = arith.constant 0 : i32
    %72 = vector.broadcast %c0_i32_24 : i32 to vector<8x1xi32>
    %73 = arith.maxsi %56, %72 : vector<8x1xi32>
    %74 = arith.subi %71, %73 : vector<8x1xi32>
    %c1_i32_25 = arith.constant 1 : i32
    %75 = vector.broadcast %c1_i32_25 : i32 to vector<8x1xi32>
    %76 = arith.addi %74, %75 : vector<8x1xi32>
    %c0_i32_26 = arith.constant 0 : i32
    %77 = vector.broadcast %c0_i32_26 : i32 to vector<8x1xi32>
    %78 = arith.cmpi sgt, %76, %77 : vector<8x1xi32>
    %79 = arith.andi %69, %78 : vector<8x1xi1>
    %c0_i32_27 = arith.constant 0 : i32
    %80 = arith.addi %52, %c0_i32_27 : i32
    %c2_i32 = arith.constant 2 : i32
    %81 = arith.muli %c2_i32, %80 : i32
    %82 = arith.index_cast %arg0 : i32 to index
    %83 = arith.index_cast %81 : i32 to index
    %84 = memref.load %arg3[%82, %83] : memref<2x16xi32, #tpu.memory_space<smem>>
    %c2_i32_28 = arith.constant 2 : i32
    %85 = arith.muli %c2_i32_28, %80 : i32
    %c1_i32_29 = arith.constant 1 : i32
    %86 = arith.addi %85, %c1_i32_29 : i32
    %87 = arith.index_cast %arg0 : i32 to index
    %88 = arith.index_cast %86 : i32 to index
    %89 = memref.load %arg3[%87, %88] : memref<2x16xi32, #tpu.memory_space<smem>>
    %90 = arith.cmpi slt, %80, %3 : i32
    %c0_i32_30 = arith.constant 0 : i32
    %91 = arith.cmpi eq, %84, %c0_i32_30 : i32
    %c0_i32_31 = arith.constant 0 : i32
    %92 = arith.cmpi eq, %89, %c0_i32_31 : i32
    %93 = arith.andi %91, %92 : i1
    %true = arith.constant true
    %94 = arith.xori %93, %true : i1
    %95 = arith.andi %90, %94 : i1
    %c16_i32 = arith.constant 16 : i32
    %96 = arith.select %95, %84, %c16_i32 : i32
    %c16_i32_32 = arith.constant 16 : i32
    %97 = arith.minsi %c16_i32_32, %96 : i32
    %c15_i32_33 = arith.constant 15 : i32
    %98 = arith.minsi %89, %c15_i32_33 : i32
    %c-1_i32 = arith.constant -1 : i32
    %99 = arith.select %95, %98, %c-1_i32 : i32
    %c-1_i32_34 = arith.constant -1 : i32
    %100 = arith.maxsi %c-1_i32_34, %99 : i32
    %c1_i32_35 = arith.constant 1 : i32
    %101 = arith.addi %52, %c1_i32_35 : i32
    %c2_i32_36 = arith.constant 2 : i32
    %102 = arith.muli %c2_i32_36, %101 : i32
    %103 = arith.index_cast %arg0 : i32 to index
    %104 = arith.index_cast %102 : i32 to index
    %105 = memref.load %arg3[%103, %104] : memref<2x16xi32, #tpu.memory_space<smem>>
    %c2_i32_37 = arith.constant 2 : i32
    %106 = arith.muli %c2_i32_37, %101 : i32
    %c1_i32_38 = arith.constant 1 : i32
    %107 = arith.addi %106, %c1_i32_38 : i32
    %108 = arith.index_cast %arg0 : i32 to index
    %109 = arith.index_cast %107 : i32 to index
    %110 = memref.load %arg3[%108, %109] : memref<2x16xi32, #tpu.memory_space<smem>>
    %111 = arith.cmpi slt, %101, %3 : i32
    %c0_i32_39 = arith.constant 0 : i32
    %112 = arith.cmpi eq, %105, %c0_i32_39 : i32
    %c0_i32_40 = arith.constant 0 : i32
    %113 = arith.cmpi eq, %110, %c0_i32_40 : i32
    %114 = arith.andi %112, %113 : i1
    %true_41 = arith.constant true
    %115 = arith.xori %114, %true_41 : i1
    %116 = arith.andi %111, %115 : i1
    %c16_i32_42 = arith.constant 16 : i32
    %117 = arith.select %116, %105, %c16_i32_42 : i32
    %118 = arith.minsi %97, %117 : i32
    %c15_i32_43 = arith.constant 15 : i32
    %119 = arith.minsi %110, %c15_i32_43 : i32
    %c-1_i32_44 = arith.constant -1 : i32
    %120 = arith.select %116, %119, %c-1_i32_44 : i32
    %121 = arith.maxsi %100, %120 : i32
    %c2_i32_45 = arith.constant 2 : i32
    %122 = arith.addi %52, %c2_i32_45 : i32
    %c2_i32_46 = arith.constant 2 : i32
    %123 = arith.muli %c2_i32_46, %122 : i32
    %124 = arith.index_cast %arg0 : i32 to index
    %125 = arith.index_cast %123 : i32 to index
    %126 = memref.load %arg3[%124, %125] : memref<2x16xi32, #tpu.memory_space<smem>>
    %c2_i32_47 = arith.constant 2 : i32
    %127 = arith.muli %c2_i32_47, %122 : i32
    %c1_i32_48 = arith.constant 1 : i32
    %128 = arith.addi %127, %c1_i32_48 : i32
    %129 = arith.index_cast %arg0 : i32 to index
    %130 = arith.index_cast %128 : i32 to index
    %131 = memref.load %arg3[%129, %130] : memref<2x16xi32, #tpu.memory_space<smem>>
    %132 = arith.cmpi slt, %122, %3 : i32
    %c0_i32_49 = arith.constant 0 : i32
    %133 = arith.cmpi eq, %126, %c0_i32_49 : i32
    %c0_i32_50 = arith.constant 0 : i32
    %134 = arith.cmpi eq, %131, %c0_i32_50 : i32
    %135 = arith.andi %133, %134 : i1
    %true_51 = arith.constant true
    %136 = arith.xori %135, %true_51 : i1
    %137 = arith.andi %132, %136 : i1
    %c16_i32_52 = arith.constant 16 : i32
    %138 = arith.select %137, %126, %c16_i32_52 : i32
    %139 = arith.minsi %118, %138 : i32
    %c15_i32_53 = arith.constant 15 : i32
    %140 = arith.minsi %131, %c15_i32_53 : i32
    %c-1_i32_54 = arith.constant -1 : i32
    %141 = arith.select %137, %140, %c-1_i32_54 : i32
    %142 = arith.maxsi %121, %141 : i32
    %c3_i32 = arith.constant 3 : i32
    %143 = arith.addi %52, %c3_i32 : i32
    %c2_i32_55 = arith.constant 2 : i32
    %144 = arith.muli %c2_i32_55, %143 : i32
    %145 = arith.index_cast %arg0 : i32 to index
    %146 = arith.index_cast %144 : i32 to index
    %147 = memref.load %arg3[%145, %146] : memref<2x16xi32, #tpu.memory_space<smem>>
    %c2_i32_56 = arith.constant 2 : i32
    %148 = arith.muli %c2_i32_56, %143 : i32
    %c1_i32_57 = arith.constant 1 : i32
    %149 = arith.addi %148, %c1_i32_57 : i32
    %150 = arith.index_cast %arg0 : i32 to index
    %151 = arith.index_cast %149 : i32 to index
    %152 = memref.load %arg3[%150, %151] : memref<2x16xi32, #tpu.memory_space<smem>>
    %153 = arith.cmpi slt, %143, %3 : i32
    %c0_i32_58 = arith.constant 0 : i32
    %154 = arith.cmpi eq, %147, %c0_i32_58 : i32
    %c0_i32_59 = arith.constant 0 : i32
    %155 = arith.cmpi eq, %152, %c0_i32_59 : i32
    %156 = arith.andi %154, %155 : i1
    %true_60 = arith.constant true
    %157 = arith.xori %156, %true_60 : i1
    %158 = arith.andi %153, %157 : i1
    %c16_i32_61 = arith.constant 16 : i32
    %159 = arith.select %158, %147, %c16_i32_61 : i32
    %160 = arith.minsi %139, %159 : i32
    %c15_i32_62 = arith.constant 15 : i32
    %161 = arith.minsi %152, %c15_i32_62 : i32
    %c-1_i32_63 = arith.constant -1 : i32
    %162 = arith.select %158, %161, %c-1_i32_63 : i32
    %163 = arith.maxsi %142, %162 : i32
    %c4_i32 = arith.constant 4 : i32
    %164 = arith.addi %52, %c4_i32 : i32
    %c2_i32_64 = arith.constant 2 : i32
    %165 = arith.muli %c2_i32_64, %164 : i32
    %166 = arith.index_cast %arg0 : i32 to index
    %167 = arith.index_cast %165 : i32 to index
    %168 = memref.load %arg3[%166, %167] : memref<2x16xi32, #tpu.memory_space<smem>>
    %c2_i32_65 = arith.constant 2 : i32
    %169 = arith.muli %c2_i32_65, %164 : i32
    %c1_i32_66 = arith.constant 1 : i32
    %170 = arith.addi %169, %c1_i32_66 : i32
    %171 = arith.index_cast %arg0 : i32 to index
    %172 = arith.index_cast %170 : i32 to index
    %173 = memref.load %arg3[%171, %172] : memref<2x16xi32, #tpu.memory_space<smem>>
    %174 = arith.cmpi slt, %164, %3 : i32
    %c0_i32_67 = arith.constant 0 : i32
    %175 = arith.cmpi eq, %168, %c0_i32_67 : i32
    %c0_i32_68 = arith.constant 0 : i32
    %176 = arith.cmpi eq, %173, %c0_i32_68 : i32
    %177 = arith.andi %175, %176 : i1
    %true_69 = arith.constant true
    %178 = arith.xori %177, %true_69 : i1
    %179 = arith.andi %174, %178 : i1
    %c16_i32_70 = arith.constant 16 : i32
    %180 = arith.select %179, %168, %c16_i32_70 : i32
    %181 = arith.minsi %160, %180 : i32
    %c15_i32_71 = arith.constant 15 : i32
    %182 = arith.minsi %173, %c15_i32_71 : i32
    %c-1_i32_72 = arith.constant -1 : i32
    %183 = arith.select %179, %182, %c-1_i32_72 : i32
    %184 = arith.maxsi %163, %183 : i32
    %c5_i32 = arith.constant 5 : i32
    %185 = arith.addi %52, %c5_i32 : i32
    %c2_i32_73 = arith.constant 2 : i32
    %186 = arith.muli %c2_i32_73, %185 : i32
    %187 = arith.index_cast %arg0 : i32 to index
    %188 = arith.index_cast %186 : i32 to index
    %189 = memref.load %arg3[%187, %188] : memref<2x16xi32, #tpu.memory_space<smem>>
    %c2_i32_74 = arith.constant 2 : i32
    %190 = arith.muli %c2_i32_74, %185 : i32
    %c1_i32_75 = arith.constant 1 : i32
    %191 = arith.addi %190, %c1_i32_75 : i32
    %192 = arith.index_cast %arg0 : i32 to index
    %193 = arith.index_cast %191 : i32 to index
    %194 = memref.load %arg3[%192, %193] : memref<2x16xi32, #tpu.memory_space<smem>>
    %195 = arith.cmpi slt, %185, %3 : i32
    %c0_i32_76 = arith.constant 0 : i32
    %196 = arith.cmpi eq, %189, %c0_i32_76 : i32
    %c0_i32_77 = arith.constant 0 : i32
    %197 = arith.cmpi eq, %194, %c0_i32_77 : i32
    %198 = arith.andi %196, %197 : i1
    %true_78 = arith.constant true
    %199 = arith.xori %198, %true_78 : i1
    %200 = arith.andi %195, %199 : i1
    %c16_i32_79 = arith.constant 16 : i32
    %201 = arith.select %200, %189, %c16_i32_79 : i32
    %202 = arith.minsi %181, %201 : i32
    %c15_i32_80 = arith.constant 15 : i32
    %203 = arith.minsi %194, %c15_i32_80 : i32
    %c-1_i32_81 = arith.constant -1 : i32
    %204 = arith.select %200, %203, %c-1_i32_81 : i32
    %205 = arith.maxsi %184, %204 : i32
    %c6_i32 = arith.constant 6 : i32
    %206 = arith.addi %52, %c6_i32 : i32
    %c2_i32_82 = arith.constant 2 : i32
    %207 = arith.muli %c2_i32_82, %206 : i32
    %208 = arith.index_cast %arg0 : i32 to index
    %209 = arith.index_cast %207 : i32 to index
    %210 = memref.load %arg3[%208, %209] : memref<2x16xi32, #tpu.memory_space<smem>>
    %c2_i32_83 = arith.constant 2 : i32
    %211 = arith.muli %c2_i32_83, %206 : i32
    %c1_i32_84 = arith.constant 1 : i32
    %212 = arith.addi %211, %c1_i32_84 : i32
    %213 = arith.index_cast %arg0 : i32 to index
    %214 = arith.index_cast %212 : i32 to index
    %215 = memref.load %arg3[%213, %214] : memref<2x16xi32, #tpu.memory_space<smem>>
    %216 = arith.cmpi slt, %206, %3 : i32
    %c0_i32_85 = arith.constant 0 : i32
    %217 = arith.cmpi eq, %210, %c0_i32_85 : i32
    %c0_i32_86 = arith.constant 0 : i32
    %218 = arith.cmpi eq, %215, %c0_i32_86 : i32
    %219 = arith.andi %217, %218 : i1
    %true_87 = arith.constant true
    %220 = arith.xori %219, %true_87 : i1
    %221 = arith.andi %216, %220 : i1
    %c16_i32_88 = arith.constant 16 : i32
    %222 = arith.select %221, %210, %c16_i32_88 : i32
    %223 = arith.minsi %202, %222 : i32
    %c15_i32_89 = arith.constant 15 : i32
    %224 = arith.minsi %215, %c15_i32_89 : i32
    %c-1_i32_90 = arith.constant -1 : i32
    %225 = arith.select %221, %224, %c-1_i32_90 : i32
    %226 = arith.maxsi %205, %225 : i32
    %c7_i32 = arith.constant 7 : i32
    %227 = arith.addi %52, %c7_i32 : i32
    %c2_i32_91 = arith.constant 2 : i32
    %228 = arith.muli %c2_i32_91, %227 : i32
    %229 = arith.index_cast %arg0 : i32 to index
    %230 = arith.index_cast %228 : i32 to index
    %231 = memref.load %arg3[%229, %230] : memref<2x16xi32, #tpu.memory_space<smem>>
    %c2_i32_92 = arith.constant 2 : i32
    %232 = arith.muli %c2_i32_92, %227 : i32
    %c1_i32_93 = arith.constant 1 : i32
    %233 = arith.addi %232, %c1_i32_93 : i32
    %234 = arith.index_cast %arg0 : i32 to index
    %235 = arith.index_cast %233 : i32 to index
    %236 = memref.load %arg3[%234, %235] : memref<2x16xi32, #tpu.memory_space<smem>>
    %237 = arith.cmpi slt, %227, %3 : i32
    %c0_i32_94 = arith.constant 0 : i32
    %238 = arith.cmpi eq, %231, %c0_i32_94 : i32
    %c0_i32_95 = arith.constant 0 : i32
    %239 = arith.cmpi eq, %236, %c0_i32_95 : i32
    %240 = arith.andi %238, %239 : i1
    %true_96 = arith.constant true
    %241 = arith.xori %240, %true_96 : i1
    %242 = arith.andi %237, %241 : i1
    %c16_i32_97 = arith.constant 16 : i32
    %243 = arith.select %242, %231, %c16_i32_97 : i32
    %244 = arith.minsi %223, %243 : i32
    %c15_i32_98 = arith.constant 15 : i32
    %245 = arith.minsi %236, %c15_i32_98 : i32
    %c-1_i32_99 = arith.constant -1 : i32
    %246 = arith.select %242, %245, %c-1_i32_99 : i32
    %247 = arith.maxsi %226, %246 : i32
    %c0_i32_100 = arith.constant 0 : i32
    %248 = arith.maxsi %244, %c0_i32_100 : i32
    %c1_i32_101 = arith.constant 1 : i32
    %249 = arith.addi %247, %c1_i32_101 : i32
    %250 = arith.subi %249, %248 : i32
    %251 = arith.addi %248, %250 : i32
    %c1_i32_102 = arith.constant 1 : i32
    %252:2 = scf.for %arg9 = %248 to %251 step %c1_i32_102 iter_args(%arg10 = %49, %arg11 = %50) -> (vector<8x128xf32>, vector<8x128xf32>)  : i32 {
      %c0_110 = arith.constant 0 : index
      %271 = arith.index_cast %arg9 : i32 to index
      %c0_111 = arith.constant 0 : index
      %272 = vector.load %arg4[%c0_110, %271, %c0_111] : memref<1x16x128xf32, #tpu.memory_space<vmem>>, vector<1x1x128xf32>
      %273 = vector.shape_cast %272 : vector<1x1x128xf32> to vector<1x128xf32>
      %274 = vector.broadcast %arg9 : i32 to vector<8x1xi32>
      %275 = arith.cmpi sge, %274, %56 : vector<8x1xi32>
      %276 = vector.broadcast %arg9 : i32 to vector<8x1xi32>
      %277 = arith.cmpi sle, %276, %57 : vector<8x1xi32>
      %278 = arith.andi %275, %277 : vector<8x1xi1>
      %279 = vector.broadcast %273 : vector<1x128xf32> to vector<8x128xf32>
      %280 = arith.minimumf %arg10, %279 : vector<8x128xf32>
      %281 = vector.shape_cast %278 : vector<8x1xi1> to vector<8x1xi1>
      %282 = vector.broadcast %281 : vector<8x1xi1> to vector<8x128xi1>
      %283 = arith.select %282, %280, %arg10 : vector<8x128xi1>, vector<8x128xf32>
      %284 = vector.broadcast %273 : vector<1x128xf32> to vector<8x128xf32>
      %285 = arith.maximumf %arg11, %284 : vector<8x128xf32>
      %286 = vector.shape_cast %278 : vector<8x1xi1> to vector<8x1xi1>
      %287 = vector.broadcast %286 : vector<8x1xi1> to vector<8x128xi1>
      %288 = arith.select %287, %285, %arg11 : vector<8x128xi1>, vector<8x128xf32>
      scf.yield %283, %288 : vector<8x128xf32>, vector<8x128xf32>
    }
    %c0_i32_103 = arith.constant 0 : i32
    %253 = arith.sitofp %c0_i32_103 : i32 to f32
    %254 = vector.shape_cast %79 : vector<8x1xi1> to vector<8x1xi1>
    %255 = vector.broadcast %254 : vector<8x1xi1> to vector<8x128xi1>
    %256 = vector.broadcast %253 : f32 to vector<8x128xf32>
    %257 = arith.select %255, %252#0, %256 : vector<8x128xi1>, vector<8x128xf32>
    %c0_104 = arith.constant 0 : index
    %258 = arith.index_cast %52 : i32 to index
    %c0_105 = arith.constant 0 : index
    %259 = vector.load %arg6[%c0_104, %258, %c0_105] : memref<1x8x128xf32, #tpu.memory_space<vmem>>, vector<1x8x128xf32>
    %260 = vector.shape_cast %259 : vector<1x8x128xf32> to vector<8x128xf32>
    %261 = vector.shape_cast %257 : vector<8x128xf32> to vector<1x8x128xf32>
    tpu.vector_store %arg6[%c0_104, %258, %c0_105], %261 {strides = array<i32>} : memref<1x8x128xf32, #tpu.memory_space<vmem>>, vector<1x8x128xf32>,
    %c0_i32_106 = arith.constant 0 : i32
    %262 = arith.sitofp %c0_i32_106 : i32 to f32
    %263 = vector.shape_cast %79 : vector<8x1xi1> to vector<8x1xi1>
    %264 = vector.broadcast %263 : vector<8x1xi1> to vector<8x128xi1>
    %265 = vector.broadcast %262 : f32 to vector<8x128xf32>
    %266 = arith.select %264, %252#1, %265 : vector<8x128xi1>, vector<8x128xf32>
    %c0_107 = arith.constant 0 : index
    %267 = arith.index_cast %52 : i32 to index
    %c0_108 = arith.constant 0 : index
    %268 = vector.load %arg7[%c0_107, %267, %c0_108] : memref<1x8x128xf32, #tpu.memory_space<vmem>>, vector<1x8x128xf32>
    %269 = vector.shape_cast %268 : vector<1x8x128xf32> to vector<8x128xf32>
    %270 = vector.shape_cast %266 : vector<8x128xf32> to vector<1x8x128xf32>
    tpu.vector_store %arg7[%c0_107, %267, %c0_108], %270 {strides = array<i32>} : memref<1x8x128xf32, #tpu.memory_space<vmem>>, vector<1x8x128xf32>,
    %c1_i32_109 = arith.constant 1 : i32
    return
  }
  func.func @transform_0(%arg0: i32, %arg1: i32, %arg2: memref<2xi32, #tpu.memory_space<smem>>, %arg3: memref<2x16xi32, #tpu.memory_space<smem>>) -> (i32, i32, i32) {
    %c0_i32 = arith.constant 0 : i32
    %c0_i32_0 = arith.constant 0 : i32
    return %arg0, %c0_i32, %arg1 : i32, i32, i32
  }
  func.func @transform_1(%arg0: i32, %arg1: i32, %arg2: memref<2xi32, #tpu.memory_space<smem>>, %arg3: memref<2x16xi32, #tpu.memory_space<smem>>) -> (i32, i32, i32) {
    %c0_i32 = arith.constant 0 : i32
    %c0_i32_0 = arith.constant 0 : i32
    %c0_i32_1 = arith.constant 0 : i32
    return %arg0, %c0_i32, %c0_i32_0 : i32, i32, i32
  }
  func.func @transform_2(%arg0: i32, %arg1: i32, %arg2: memref<2xi32, #tpu.memory_space<smem>>, %arg3: memref<2x16xi32, #tpu.memory_space<smem>>) -> (i32, i32, i32) {
    %c0_i32 = arith.constant 0 : i32
    %c0_i32_0 = arith.constant 0 : i32
    return %arg0, %c0_i32, %arg1 : i32, i32, i32
  }
  func.func @transform_3(%arg0: i32, %arg1: i32, %arg2: memref<2xi32, #tpu.memory_space<smem>>, %arg3: memref<2x16xi32, #tpu.memory_space<smem>>) -> (i32, i32, i32) {
    %c0_i32 = arith.constant 0 : i32
    %c0_i32_0 = arith.constant 0 : i32
    return %arg0, %c0_i32, %arg1 : i32, i32, i32
  }
  func.func @transform_4(%arg0: i32, %arg1: i32, %arg2: memref<2xi32, #tpu.memory_space<smem>>, %arg3: memref<2x16xi32, #tpu.memory_space<smem>>) -> (i32, i32, i32) {
    %c0_i32 = arith.constant 0 : i32
    %c0_i32_0 = arith.constant 0 : i32
    return %arg0, %c0_i32, %arg1 : i32, i32, i32
  }
}

</mosaic_0001>

<bundles_post_ra>
// kernel: tpu_custom_call.1
= control target key start
LH: loop header
LB: loop body
LE: loop exit
PB: predicated region body
PF: predicated region fallthrough
CT: control target
= control target key end

     0   :  { %s1393_s27 = smov [#allocation3]   ;;  %s1394_s28 = smov [#allocation4]   ;;  %s1786_s0 = inlined_call_operand.vmem [shape: s32[2], index: 0, kind: input, shape index: {}]   ;;  %s1787_s2 = inlined_call_operand.hbm [shape: f32[2,16,128], index: 2, kind: input, shape index: {}]   ;;  %s1788_s3 = inlined_call_operand.vmem [shape: s32[2,8,2], index: 3, kind: input, shape index: {}]   ;;  %s1789_s4 = inlined_call_operand.hbm [shape: f32[2,8,128], index: 4, kind: output, shape index: {0}]   ;;  %s1790_s5 = inlined_call_operand.hbm [shape: f32[2,8,128], index: 5, kind: output, shape index: {1}]   ;;  %s1791_s6 = inlined_call_operand.hbm [shape: f32[2,8,128], index: 6, kind: output, shape index: {2}]   ;;  %s1792_s1 = inlined_call_operand.vmem [shape: s32[2,16], index: 1, kind: input, shape index: {}]  }
   0x1   :  { %1797 = sst [smem:[#allocation18_spill]] %s1787_s2  ;;  %s13_s23 = sshll.u32 %s1786_s0, 4  ;;  %s14_s23 = int_to_ptr.vmem [resolvable:$true] %s13_s23 }
   0x2   :  { %s18_s26 = sshll.u32 %s1792_s1, 4  ;;  %s19_s26 = int_to_ptr.vmem [resolvable:$true] %s18_s26 }
   0x3   :  { %16 = dma.vmem_to_smem %s14_s23, 16, %s1393_s27, [#allocation2] }
   0x4   :  { %21 = dma.vmem_to_smem %s19_s26, 32, %s1394_s28, [#allocation2] }
   0x5   :  { %1335 = dma.done.wait [#allocation2], 48 }
   0x6   :  { %1336 = vsyncadd [#allocation2], 4294967248 }
   0x7   :  { %24 = sfence }
   0x8   :  { %25 = vsyncpa [#allocation6], 0 }
   0x9   :  { %27 = vsyncpa [#allocation6 + $0x1], 0 }
   0xa   :  { %28 = vsyncpa [#allocation7], 0 }
   0xb   :  { %30 = vsyncpa [#allocation7 + $0x1], 0 }
   0xc   :  { %31 = vsyncpa [#allocation10], 0 }
   0xd   :  { %33 = vsyncpa [#allocation10 + $0x1], 0  ;;  %s1446_s0 = smov 0   ;;  %s1448_s29 = smov 0  }
   0xe   :  { %s1450_s1 = smov 0   ;;  %s1452_s30 = smov 0  }
   0xf   :  { %s1454_s7 = smov 0   ;;  %s1456_s8 = smov 0  }
  0x10 LB: > { %s1477_s9 = sadd.s32 4294967295, %s1371_s8   ;;  %s1793_s10 = sadd.s32 4294967294, %s1371_s8   ;;  %s1371_s8 = sphi %s1456_s8, %s39_s8   ;;  %s1367_s7 = sphi %s1454_s7, %s1822_s7   ;;  %s1363_s30 = sphi %s1452_s30, %s1821_s30   ;;  %s1359_s1 = sphi %s1450_s1, %s1820_s1   ;;  %s1355_s29 = sphi %s1448_s29, %s1819_s29   ;;  %s1351_s0 = sphi %s1446_s0, %s1818_s0  }
  0x11   : > { %s51_s11 = sadd.s32 1, %s1367_s7  ;;  %s60_s12 = sadd.s32 1, %s1359_s1 }
  0x12   : > { %p53_p0 = scmp.ge.s32.totalorder %s51_s11, 2  ;;  %p67_p1 = scmp.ne.s32.totalorder %s1359_s1, %s1355_s29 }
  0x13   : > { %p68_p2 = scmp.eq.s32.totalorder %s1371_s8, 0  ;;  %p73_p3 = scmp.ne.s32.totalorder %s1355_s29, %s1351_s0 }
  0x14   : > { %s1824_s11 = smov (%p53_p0, %s51_s11), 0  ;;  %p74_p5 = scmp.eq.s32.totalorder %s1477_s9, 0 }
  0x15   : > { %1798 = sst [smem:[#allocation16_spill]] %s1824_s11  ;;  %p1489_p4 = por %p68_p2, %p67_p1 }
  0x16   : > { %s55_s14 = ssub.s32 %s1367_s7, %s1824_s11  ;;  %p125_p6 = scmp.eq.s32.totalorder %s1477_s9, 1 }
  0x17   : > { %p58_p7 = scmp.eq.s32.totalorder %s55_s14, 0  ;;  %p1497_p8 = por %p74_p5, %p73_p3 }
  0x18   : > { %p1501_p9 = por %p125_p6, %p67_p1  ;;  %p131_p10 = scmp.eq.s32.totalorder %s1793_s10, 1 }
  0x19   : > { %s1508_s17 = scalar_select %p58_p7, %s1359_s1, %s60_s12  }
  0x1a   : > { %s1801_s16 = scalar_select %p1501_p9, 1, 0 }
  0x1b   : > { %p1510_p11 = por %p131_p10, %p73_p3  ;;  %p1043_p13 = scmp.lt.s32.totalorder %s1371_s8, 2 }
  0x1c   : > { %s207_s19 = sand.u32 1, %s1359_s1   ;;  %s1020_s21 = sshll.u32 %s1367_s7, 4 }
  0x1d   : > { %s1802_s18 = scalar_select %p1510_p11, 1, 0 }
  0x1e   : > { %s961_s20 = sshll.u32 %s207_s19, 4  ;;  %s1803_s2 = sld [smem:[#allocation18_spill]] }
  0x1f   : > { %s211_s25 = scalar_lea.vmem [#allocation5], %s961_s20  ;;  %p1030_p0 = pnand %p1043_p13, %p1489_p4 }
  0x20   : > { %s220_s26 = sshll.u32 %s211_s25, 4  ;;  %p964_p1 = scmp.ge.s32.totalorder %s1371_s8, 1  ;;  %s221_s26 = int_to_ptr.vmem [resolvable:$true] %s220_s26 }
  0x21   : > { %s208_s28 = scalar_lea.sflag [#allocation6], %s207_s19  ;;  %s1395_s12 = smov 128  }
  0x22   : > { %s1396_s14 = smov 8   ;;  %p235_p2 = scmp.lt.s32.totalorder %s1371_s8, 3 }
  0x24   : > { %s217_s24 = scalar_lea.hbm %s1803_s2, %s1020_s21  ;;  %p236_p3 = pnand %p964_p1, %p235_p2 }
  0x25   : > { %s218_s27 = sshll.u32 %s217_s24, 4  ;;  %s219_s27 = int_to_ptr.hbm [resolvable:$true] %s218_s27 }
  0x26   : > { %1032 = dma.hbm_to_vmem [thread:$0]  (!%p1030_p0), %s219_s27, 256, %s221_s26, %s208_s28, %s1395_s12, %s1395_s12, %s1396_s14  }
  0x27   : > { %239 = sbr.rel (%p236_p3) target bundleno = 877 (0x36d), region = 28 }
  0x2c   : > { %s1526_s10 = sand.u32 1, %s1355_s29  }
  0x2d   : > { %s965_s20 = sshll.u32 %s1526_s10, 4  ;;  %s242_s21 = scalar_lea.sflag [#allocation6], %s1526_s10 }
  0x2e   : > { %s1530_s22 = scalar_lea.vmem [#allocation5], %s965_s20 }
  0x2f   : > { %1338 = dma.done.wait (%p1497_p8), %s242_s21, 256  }
  0x30   : > { %1340 = vsyncadd (%p1497_p8), %s242_s21, 4294967040  ;;  %s1537_s13 = sshll.u32 %s1363_s30, 7  ;;  %s1540_s19 = sld [smem:[#allocation3 + %s1363_s30]]  ;;  %v1397_v0 = vmov 0   ;;  %v1400_v4 = vmov 1   ;;  %v290_v25 = vld [vmem:[%s1530_s22 + $0x8] sm:$0xff]  ;;  %v293_v29 = vlaneseq }
  0x31   : > { %s427_s23 = sadd.s32 1, %s1537_s13  ;;  %s419_s24 = sld [smem:[#allocation4 + %s1537_s13]]  ;;  %1145 = vset.pattern.permute.xlu0 %v1397_v0  ;;  %v289_v26 = vld [vmem:[%s1530_s22] sm:$0xff]  ;;  %350 = vmatpush.msra.mxu0 %v290_v25  ;;  %vm332_vm11 = vcmask 130048   ;;  %v1401_v32 = vmov 0.0   ;;  %vm1402_vm15 = vmmov 1  }
  0x32   : > { %s453_s25 = sadd.s32 2, %s1537_s13  ;;  %s428_s15 = sld [smem:[#allocation4 + %s427_s23]]  ;;  %v320_v30 = vand.u32 127, %v293_v29  ;;  %v294_v35 = vshrl.u32 %v293_v29, 7  ;;  %v1385_v47 = vmov -inf   ;;  %v1389_v48 = vmov inf  }
  0x33   : > { %s462_s26 = sadd.s32 3, %s1537_s13  ;;  %s454_s27 = sld [smem:[#allocation4 + %s453_s25]]  ;;  %351 = vmatpush.msra.mxu0 %v289_v26 }
  0x34   : > { %s488_s28 = sadd.s32 4, %s1537_s13  ;;  %s463_s12 = sld [smem:[#allocation4 + %s462_s26]] }
  0x35   : > { %s497_s14 = sadd.s32 5, %s1537_s13  ;;  %s1548_s20 = sld [smem:[#allocation4 + %s488_s28]] }
  0x36   : > { %s523_s21 = sadd.s32 6, %s1537_s13  ;;  %p974_p4 = scmp.gt.s32.totalorder %s1540_s19, 0  ;;  %v295_v36 = vstv %s1540_s19 }
  0x37   : > { %p430_p6 = scmp.eq.s32.totalorder %s419_s24, 0  ;;  %s1553_s2 = sld [smem:[#allocation4 + %s497_s14]] }
  0x38   : > { %p431_p7 = scmp.eq.s32.totalorder %s428_s15, 0  ;;  %p440_p8 = scmp.lt.s32.totalorder %s428_s15, 15 }
  0x39   : > { %p465_p10 = scmp.eq.s32.totalorder %s454_s27, 0  ;;  %p1804_p9 = scmp.gt.s32.totalorder %s1540_s19, 1 }
  0x3a   : > { %p432_p0 = pnand %p431_p7, %p430_p6  ;;  %p466_p1 = scmp.eq.s32.totalorder %s463_s12, 0 }
  0x3b   : > { %s1826_s15 = smov (!%p440_p8, %s428_s15), 15  ;;  %p475_p12 = scmp.lt.s32.totalorder %s463_s12, 15 }
  0x3c   : > { %p435_p2 = pnand %p974_p4, %p432_p0  ;;  %p467_p3 = pnand %p466_p1, %p465_p10 }
  0x3d   : > { %p500_p11 = scmp.eq.s32.totalorder %s1548_s20, 0  ;;  %p501_p7 = scmp.eq.s32.totalorder %s1553_s2, 0 }
  0x3e   : > { %s1828_s24 = smov (%p435_p2, %s419_s24), 16  ;;  %s1830_s15 = smov (%p435_p2, %s1826_s15), 4294967295 }
  0x3f   : > { %p438_p5 = scmp.lt.s32.totalorder %s1828_s24, 16  ;;  %p470_p13 = pnand %p1804_p9, %p467_p3 }
  0x40   : > { %p443_p6 = scmp.gt.s32.totalorder %s1830_s15, 4294967295  ;;  %s1838_s12 = smov (!%p475_p12, %s463_s12), 15 }
  0x41   : > { %s1832_s24 = smov (!%p438_p5, %s1828_s24), 16  ;;  %s1836_s27 = smov (%p470_p13, %s454_s27), 16 }
  0x42   : > { %s1834_s15 = smov (!%p443_p6, %s1830_s15), 4294967295  ;;  %p473_p4 = scmp.lt.s32.totalorder %s1832_s24, %s1836_s27 }
  0x43   : > { %p502_p8 = pnand %p501_p7, %p500_p11  ;;  %s1840_s12 = smov (%p470_p13, %s1838_s12), 4294967295 }
  0x44   : > { %s1842_s24 = smov (!%p473_p4, %s1832_s24), %s1836_s27  ;;  %p478_p10 = scmp.gt.s32.totalorder %s1834_s15, %s1840_s12 }
  0x45   : > { %p1805_p0 = scmp.gt.s32.totalorder %s1540_s19, 2  ;;  %p510_p9 = scmp.lt.s32.totalorder %s1553_s2, 15 }
  0x46   : > { %s1565_s23 = sld [smem:[#allocation4 + %s523_s21]]  ;;  %s1844_s15 = smov (!%p478_p10, %s1834_s15), %s1840_s12 }
  0x47   : > { %p505_p1 = pnand %p1805_p0, %p502_p8  ;;  %s1848_s2 = smov (!%p510_p9, %s1553_s2), 15 }
  0x48   : > { %s532_s25 = sadd.s32 7, %s1537_s13  ;;  %p989_p5 = scmp.gt.s32.totalorder %s1540_s19, 3 }
  0x49   : > { %s1846_s20 = smov (%p505_p1, %s1548_s20), 16  ;;  %s1850_s2 = smov (%p505_p1, %s1848_s2), 4294967295 }
  0x4a   : > { %p508_p12 = scmp.lt.s32.totalorder %s1842_s24, %s1846_s20  ;;  %p513_p11 = scmp.gt.s32.totalorder %s1844_s15, %s1850_s2 }
  0x4b   : > { %s533_s26 = sld [smem:[#allocation4 + %s532_s25]]  ;;  %s558_s27 = sadd.s32 8, %s1537_s13 }
  0x4c   : > { %s1852_s24 = smov (!%p508_p12, %s1842_s24), %s1846_s20  ;;  %p535_p13 = scmp.eq.s32.totalorder %s1565_s23, 0 }
  0x4d   : > { %s1854_s15 = smov (!%p513_p11, %s1844_s15), %s1850_s2  ;;  %s567_s28 = sadd.s32 9, %s1537_s13 }
  0x4e   : > { %s559_s14 = sld [smem:[#allocation4 + %s558_s27]]  ;;  %p994_p2 = scmp.gt.s32.totalorder %s1540_s19, 4 }
  0x4f   : > { %s568_s12 = sld [smem:[#allocation4 + %s567_s28]]  ;;  %s593_s21 = sadd.s32 10, %s1537_s13 }
  0x50   : > { %s1578_s20 = sld [smem:[#allocation4 + %s593_s21]]  ;;  %s602_s11 = sadd.s32 11, %s1537_s13 }
  0x51   : > { %p536_p3 = scmp.eq.s32.totalorder %s533_s26, 0  ;;  %p545_p6 = scmp.lt.s32.totalorder %s533_s26, 15 }
  0x52   : > { %s603_s25 = sld [smem:[#allocation4 + %s602_s11]]  ;;  %p999_p11 = scmp.gt.s32.totalorder %s1540_s19, 5 }
  0x53   : > { %p537_p7 = pnand %p536_p3, %p535_p13  ;;  %s1856_s26 = smov (!%p545_p6, %s533_s26), 15 }
  0x54   : > { %p570_p8 = scmp.eq.s32.totalorder %s559_s14, 0  ;;  %s628_s2 = sadd.s32 12, %s1537_s13 }
  0x55   : > { %p540_p4 = pnand %p989_p5, %p537_p7  ;;  %p571_p10 = scmp.eq.s32.totalorder %s568_s12, 0 }
  0x56   : > { %p580_p0 = scmp.lt.s32.totalorder %s568_s12, 15  ;;  %p605_p3 = scmp.eq.s32.totalorder %s1578_s20, 0 }
  0x57   : > { %s1858_s23 = smov (%p540_p4, %s1565_s23), 16  ;;  %s1860_s26 = smov (%p540_p4, %s1856_s26), 4294967295 }
  0x58   : > { %p543_p1 = scmp.lt.s32.totalorder %s1852_s24, %s1858_s23  ;;  %p572_p9 = pnand %p571_p10, %p570_p8 }
  0x59   : > { %p548_p12 = scmp.gt.s32.totalorder %s1854_s15, %s1860_s26  ;;  %s1866_s12 = smov (!%p580_p0, %s568_s12), 15 }
  0x5a   : > { %s1862_s24 = smov (!%p543_p1, %s1852_s24), %s1858_s23  ;;  %p575_p13 = pnand %p994_p2, %p572_p9 }
  0x5b   : > { %s1864_s15 = smov (!%p548_p12, %s1854_s15), %s1860_s26  ;;  %p606_p6 = scmp.eq.s32.totalorder %s603_s25, 0 }
  0x5c   : > { %s1868_s14 = smov (%p575_p13, %s559_s14), 16  ;;  %s1870_s12 = smov (%p575_p13, %s1866_s12), 4294967295 }
  0x5d   : > { %p578_p5 = scmp.lt.s32.totalorder %s1862_s24, %s1868_s14  ;;  %p583_p7 = scmp.gt.s32.totalorder %s1864_s15, %s1870_s12 }
  0x5e   : > { %p615_p4 = scmp.lt.s32.totalorder %s603_s25, 15  ;;  %p607_p8 = pnand %p606_p6, %p605_p3 }
  0x5f   : > { %s1872_s24 = smov (!%p578_p5, %s1862_s24), %s1868_s14  ;;  %s1874_s15 = smov (!%p583_p7, %s1864_s15), %s1870_s12 }
  0x60   : > { %s1876_s25 = smov (!%p615_p4, %s603_s25), 15  ;;  %p610_p10 = pnand %p999_p11, %p607_p8 }
  0x61   : > { %s629_s11 = sld [smem:[#allocation4 + %s628_s2]]  ;;  %s637_s23 = sadd.s32 13, %s1537_s13 }
  0x62   : > { %s1878_s20 = smov (%p610_p10, %s1578_s20), 16  ;;  %s1880_s25 = smov (%p610_p10, %s1876_s25), 4294967295 }
  0x63   : > { %p613_p2 = scmp.lt.s32.totalorder %s1872_s24, %s1878_s20  ;;  %s638_s26 = sld [smem:[#allocation4 + %s637_s23]] }
  0x64   : > { %p618_p0 = scmp.gt.s32.totalorder %s1874_s15, %s1880_s25  ;;  %s663_s27 = sadd.s32 14, %s1537_s13 }
  0x65   : > { %s1882_s24 = smov (!%p613_p2, %s1872_s24), %s1878_s20  ;;  %s664_s28 = sld [smem:[#allocation4 + %s663_s27]] }
  0x66   : > { %s1884_s15 = smov (!%p618_p0, %s1874_s15), %s1880_s25  ;;  %p1004_p9 = scmp.gt.s32.totalorder %s1540_s19, 6 }
  0x67   : > { %p640_p1 = scmp.eq.s32.totalorder %s629_s11, 0  ;;  %s672_s14 = sadd.s32 15, %s1537_s13 }
  0x68   : > { %s673_s12 = sld [smem:[#allocation4 + %s672_s14]]  ;;  %p285_p13 = scmp.lt.s32.totalorder %s1363_s30, 1 }
  0x69   : > { %p641_p12 = scmp.eq.s32.totalorder %s638_s26, 0  ;;  %p650_p11 = scmp.lt.s32.totalorder %s638_s26, 15 }
  0x6a   : > { %s286_s21 = scalar_select %p285_p13, %s1363_s30, 1 }
  0x6b   : > { %p642_p3 = pnand %p641_p12, %p640_p1  ;;  %s1886_s26 = smov (!%p650_p11, %s638_s26), 15 }
  0x6c   : > { %p675_p6 = scmp.eq.s32.totalorder %s664_s28, 0  ;;  %p1009_p8 = scmp.gt.s32.totalorder %s1540_s19, 7 }
  0x6d   : > { %p645_p5 = pnand %p1004_p9, %p642_p3  ;;  %s969_s20 = sshll.u32 %s286_s21, 3 }
  0x6e   : > { %p676_p4 = scmp.eq.s32.totalorder %s673_s12, 0  ;;  %p685_p10 = scmp.lt.s32.totalorder %s673_s12, 15 }
  0x6f   : > { %s1888_s11 = smov (%p645_p5, %s629_s11), 16  ;;  %s1890_s26 = smov (%p645_p5, %s1886_s26), 4294967295 }
  0x70   : > { %p648_p7 = scmp.lt.s32.totalorder %s1882_s24, %s1888_s11  ;;  %p653_p2 = scmp.gt.s32.totalorder %s1884_s15, %s1890_s26 }
  0x71   : > { %p677_p0 = pnand %p676_p4, %p675_p6  ;;  %s1894_s12 = smov (!%p685_p10, %s673_s12), 15 }
  0x72   : > { %s1892_s24 = smov (!%p648_p7, %s1882_s24), %s1888_s11  ;;  %s288_s2 = scalar_lea.vmem %s1788_s3, %s969_s20 }
  0x73   : > { %p680_p1 = pnand %p1009_p8, %p677_p0  ;;  %s1896_s15 = smov (!%p653_p2, %s1884_s15), %s1890_s26  ;;  %v1605_v1 = vld [vmem:[%s288_s2] sm:$0xff] }
  0x74   : > { %vm307_vm0 = vcmp.gt.s32.totalorder %v1605_v1, 0  ;;  %322 = vperm.xlu0 %1145, %v1605_v1   ;;  %s1398_s11 = smov 1   ;;  %vm297_vm1 = vcmp.eq.s32.totalorder %v1605_v1, 0  ;;  %s1399_s26 = smov 127   ;;  %vm305_vm2 = vcmp.lt.s32.totalorder %v1605_v1, 15 }
  0x75   : > { %s1898_s28 = smov (%p680_p1, %s664_s28), 16  ;;  %s1900_s12 = smov (%p680_p1, %s1894_s12), 4294967295  ;;  %v308_v2 = vsel %vm307_vm0, %v1605_v1, 0  ;;  %v298_v3 = vsel %vm297_vm1, 1, %v1397_v0  ;;  %v306_v5 = vsel %vm305_vm2, %v1605_v1, 15  ;;  %vm1639_vm2 = vcmp.lt.s32.totalorder %v294_v35, %v295_v36 }
  0x76   : > { %p683_p9 = scmp.lt.s32.totalorder %s1892_s24, %s1898_s28  ;;  %309 = vrot.lane.b32.xlu1 %v308_v2, %s1398_s11  ;;  %401 = vrot.lane.b32.xlu2 %v308_v2, %s1398_s11  ;;  %p688_p12 = scmp.gt.s32.totalorder %s1896_s15, %s1900_s12 }
  0x77   : > { %s1633_s27 = sshll.u32 %s1526_s10, 3 }
  0x78   : > { %s1902_s24 = smov (!%p683_p9, %s1892_s24), %s1898_s28  ;;  %s1904_s15 = smov (!%p688_p12, %s1896_s15), %s1900_s12 }
  0x79   : > { %p690_p11 = scmp.gt.s32.totalorder %s1902_s24, 0  ;;  %s692_s23 = sadd.s32 1, %s1904_s15 }
  0x7a   : > { %s284_s19 = scalar_lea.vmem [#allocation11], %s1633_s27  ;;  %s270_s28 = scalar_lea.vmem [#allocation8], %s1633_s27 }
  0x7b   : > { %s1906_s24 = smov (!%p690_p11, %s1902_s24), 0  ;;  %s277_s14 = scalar_lea.vmem [#allocation9], %s1633_s27 }
  0x7c   : > { %1146 = vset.pattern.permute.xlu0 %v1400_v4  ;;  %p891_p13 = scmp.ge.s32.totalorder %s1906_s24, %s692_s23 }
  0x7d   : > { %326 = vperm.xlu0 %1146, %v1605_v1  }
  0x7e   : > { %299 = vrot.lane.b32.xlu1 %v298_v3, %s1399_s26 }
  0x85   : > { %1147 = vset.pattern.permute.xlu0 %v1397_v0 }
  0xd0   : > { %v402_v22 = vpop.permute.xlu2 %401 }
  0xd1   : > { %v403_v23 = vsub.s32 %v306_v5, %v402_v22 }
  0xd3   : > { %v404_v24 = vadd.s32 1, %v403_v23 }
  0xd5   : > { %vm405_vm8 = vcmp.gt.s32.totalorder %v404_v24, 0 }
  0xd6   : > { %v406_v27 = vsel %vm405_vm8, 1, %v1397_v0 }
  0xe6   : > { %v323_v28 = vpop.permute.xlu0 %322 }
  0xe7   : > { %vm324_vm9 = vcmp.ge.s32.totalorder %v320_v30, %v323_v28 }
  0xe8   : > { %v310_v6 = vpop.permute.xlu1 %309 }
  0xe9   : > { %v311_v7 = vsub.s32 %v306_v5, %v310_v6 }
  0xeb   : > { %v312_v8 = vadd.s32 1, %v311_v7 }
  0xed   : > { %v356_v9 = vcvt.s32.f32 %v312_v8  ;;  %vm313_vm3 = vcmp.gt.s32.totalorder %v312_v8, 0 }
  0xee   : > { %v314_v10 = vsel %vm313_vm3, 1, %v1397_v0 }
  0xef   : > { %v357_v11 = vmax.f32 %v356_v9, 1.0  ;;  %315 = vrot.lane.b32.xlu2 %v314_v10, %s1399_s26  ;;  %v327_v31 = vpop.permute.xlu0 %326 }
  0xf0   : > { %vm328_vm10 = vcmp.le.s32.totalorder %v320_v30, %v327_v31  ;;  %v300_v34 = vpop.permute.xlu1 %299 }
  0xf1   : > { %1148 = vrcp.f32 %v357_v11  ;;  %v369_v15 = vand.u32 2147483648, %v357_v11  ;;  %v367_v17 = vand.u32 2147483647, %v357_v11  ;;  %vm363_vm5 = vweird.f32 %v357_v11  ;;  %vm329_vm12 = vmand %vm324_vm9, %vm328_vm10 }
  0xf2   : > { %v970_v33 = vsel %vm329_vm12, 1.0, %v1401_v32  ;;  %vm301_vm13 = vcmp.ne.s32.totalorder %v300_v34, 0 }
  0xf3   : > { %v370_v19 = vor.u32 1.1754944e-38, %v369_v15  ;;  %vm368_vm7 = vcmp.eq.f32.partialorder %v367_v17, 8.507059e+37  ;;  %971 = vmatmul.msk.f32.vlgmr.msra.gmra.mxu0 %vm332_vm11, %v970_v33  ;;  %vm302_vm14 = vmand %vm297_vm1, %vm301_vm13 }
  0xf4   : > { %vm303_vm0 = vmxor %vm302_vm14, %vm1402_vm15 }
  0xf7   : > { %v1149_v12 = vpop.eup %1148  ;;  %391 = vrot.lane.b32.xlu2 %v298_v3, %s1399_s26 }
  0xf8   : > { %v359_v13 = vmul.f32 %v1149_v12, %v357_v11  ;;  %vm364_vm4 = vweird.f32 %v1149_v12 }
  0xf9   : > { %vm365_vm6 = vmor %vm363_vm5, %vm364_vm4 }
  0xfa   : > { %v360_v14 = vsub.f32 1.0, %v359_v13  ;;  %vm304_vm4 = vmand %vm1639_vm2, %vm303_vm0 }
  0xfc   : > { %v361_v16 = vmul.f32 %v1149_v12, %v360_v14 }
  0xfe   : > { %v362_v18 = vadd.f32 %v1149_v12, %v361_v16 }
 0x100   : > { %v366_v20 = vsel %vm365_vm6, %v1149_v12, %v362_v18 }
 0x101   : > { %v371_v21 = vsel %vm368_vm7, %v370_v19, %v366_v20 }
 0x102   : > { %374 = vrot.lane.b32.xlu1 %v371_v21, %s1399_s26 }
 0x10a   : > { %407 = vrot.lane.b32.xlu1 %v406_v27, %s1399_s26 }
 0x149   : > { %v316_v37 = vpop.permute.xlu2 %315 }
 0x14a   : > { %vm317_vm3 = vcmp.ne.s32.totalorder %v316_v37, 0 }
 0x14b   : > { %vm318_vm5 = vmand %vm304_vm4, %vm317_vm3 }
 0x151   : > { %v392_v41 = vpop.permute.xlu2 %391 }
 0x152   : > { %vm393_vm6 = vcmp.ne.s32.totalorder %v392_v41, 0 }
 0x153   : > { %vm394_vm7 = vmand %vm297_vm1, %vm393_vm6 }
 0x154   : > { %vm395_vm9 = vmxor %vm394_vm7, %vm1402_vm15 }
 0x155   : > { %vm396_vm10 = vmand %vm1639_vm2, %vm395_vm9 }
 0x170   : > { %v353_v44 = vpop.f32.mrf.mxu0 }
 0x174   : > { %v375_v39 = vpop.permute.xlu1 %374 }
 0x175   : > { %v377_v40 = vsel %vm318_vm5, %v375_v39, 0.0 }
 0x176   : > { %380 = vperm.xlu0 %1147, %v377_v40  }
 0x17c   : > { %v408_v42 = vpop.permute.xlu1 %407 }
 0x17d   : > { %vm409_vm8 = vcmp.ne.s32.totalorder %v408_v42, 0 }
 0x17e   : > { %vm1650_vm11 = vmand %vm396_vm10, %vm409_vm8 }
 0x1e7   : > { %894 = sbr.rel (%p891_p13) target bundleno = 732 (0x2dc), region = 110 }
 0x1e8   : > { %v381_v45 = vpop.permute.xlu0 %380 }
 0x1e9   : > { %v383_v46 = vmul.f32 %v381_v45, %v353_v44 }
 0x1eb   : > { %384 = vst [vmem:[%s284_s19] sm:$0xff] %v383_v46 }
 0x1ec   : > { %v1373_v49 = vmov -inf   ;;  %v1377_v50 = vmov inf  }
 0x1ed LB: >> { %v1403_v51 = vmov 0   ;;  %v703_v52 = vstv %s1383_s24  ;;  %s701_s12 = scalar_lea.vmem %s1530_s22, %s1383_s24 [#allocation5]  ;;  %s1404_s21 = smov 127   ;;  %s1383_s24 = sphi %s1906_s24, %s696_s24   ;;  %v1379_v50 = vphi %v1377_v50, %v1378_v50   ;;  %v1375_v49 = vphi %v1373_v49, %v1374_v49  }
 0x1ee   : >> { %1150 = vset.pattern.permute.xlu0 %v1403_v51  ;;  %vm705_vm1 = vcmp.le.s32.totalorder %v703_v52, %v1605_v1  ;;  %vm704_vm12 = vcmp.ge.s32.totalorder %v703_v52, %v1605_v1  ;;  %v1151_v56 = vld [vmem:[%s701_s12] ss:$0 sm:$0xff]  ;;  %s696_s24 = sadd.s32 1, %s1383_s24  }
 0x1ef   : >> { %v706_v53 = vsel %vm705_vm1, 1, %v1403_v51  ;;  %v712_v57 = vmin.f32 %v1379_v50, %v1151_v56  ;;  %v719_v58 = vmax.f32 %v1375_v49, %v1151_v56  ;;  %p695_p3 = scmp.ge.s32.totalorder %s696_s24, %s692_s23 }
 0x1f0   : >> { %707 = vrot.lane.b32.xlu0 %v706_v53, %s1404_s21 }
 0x262   : >> { %v708_v54 = vpop.permute.xlu0 %707 }
 0x263   : >> { %vm709_vm13 = vcmp.ne.s32.totalorder %v708_v54, 0 }
 0x264   : >> { %vm710_vm14 = vmand %vm704_vm12, %vm709_vm13 }
 0x265   : >> { %v713_v55 = vsel %vm710_vm14, 1, %v1403_v51 }
 0x266   : >> { %715 = vperm.xlu0 %1150, %v713_v55  }
 0x2d7   : > { %698 = sbr.rel (!%p695_p3) target bundleno = 493 (0x1ed), region = 116 }
 0x2d8   : >> { %v716_v59 = vpop.permute.xlu0 %715 }
 0x2d9   : >> { %vm717_vm15 = vcmp.eq.s32.totalorder %v716_v59, 1 }
 0x2da   : >> { %v718_v60 = vsel %vm717_vm15, %v712_v57, %v1379_v50   ;;  %v720_v61 = vsel %vm717_vm15, %v719_v58, %v1375_v49  }
 0x2db   : >> { %v1374_v49 = vmov %v720_v61   ;;  %v1378_v50 = vmov %v718_v60   ;;  %v1386_v47 = vmov (%p695_p3), %v720_v61   ;;  %v1390_v48 = vmov (%p695_p3), %v718_v60  }
 0x2dc PF: > { %1152 = vset.pattern.permute.xlu0 %v1397_v0  ;;  %v721_v62 = vsel %vm1650_vm11, 1, %v1397_v0  ;;  %s1015_s24 = sshll.u32 %s1363_s30, 3  ;;  %s735_s20 = sand.u32 1, %s1477_s9   ;;  %v1391_v48 = vphi %v1389_v48, %v1390_v48   ;;  %v1387_v47 = vphi %v1385_v47, %v1386_v47  }
 0x2dd   : > { %723 = vperm.xlu0 %1152, %v721_v62   ;;  %s752_s13 = scalar_lea.hbm %s1789_s4, %s1015_s24  ;;  %s767_s11 = scalar_lea.hbm %s1790_s5, %s1015_s24 }
 0x2de   : > { %s1687_s23 = sshll.u32 %s277_s14, 4  ;;  %s782_s21 = scalar_lea.hbm %s1791_s6, %s1015_s24 }
 0x2df   : > { %1810 = sst [smem:[#allocation17_spill]] %s1687_s23  ;;  %s1694_s30 = sshll.u32 %s270_s28, 4  ;;  %s755_s30 = int_to_ptr.vmem [resolvable:$true] %s1694_s30 }
 0x2e0   : > { %s1696_s22 = sshll.u32 %s752_s13, 4  ;;  %s1698_s15 = sshll.u32 %s767_s11, 4  ;;  %s757_s22 = int_to_ptr.hbm [resolvable:$true] %s1696_s22  ;;  %s772_s15 = int_to_ptr.hbm [resolvable:$true] %s1698_s15 }
 0x2e1   : > { %s1702_s25 = sshll.u32 %s284_s19, 4  ;;  %s1704_s2 = sshll.u32 %s782_s21, 4  ;;  %s785_s25 = int_to_ptr.vmem [resolvable:$true] %s1702_s25  ;;  %s787_s2 = int_to_ptr.hbm [resolvable:$true] %s1704_s2 }
 0x2e2   : > { %s731_s19 = scalar_lea.sflag [#allocation7], %s1526_s10  ;;  %s1221_s24 = sshra.s32 %s757_s22, 4  ;;  %s1222_s24 = int_to_ptr.hbm [resolvable:$true] %s1221_s24 }
 0x2e3   : > { %s1223_s13 = scalar_lea.hbm %s1222_s24, 8  ;;  %p1811_p6 = scmp.ne.s32.totalorder %s1801_s16, 0 }
 0x2e4   : > { %p1224_p5 = scmp.ne.s32.totalorder %s1222_s24, %s1223_s13  ;;  %s1227_s12 = scalar_lea.hbm %s1789_s4, 16 }
 0x2e5   : > { %p1228_p8 = scmp.lt.s32.totalorder %s1222_s24, %s1789_s4  ;;  %p1229_p10 = scmp.lt.s32.totalorder %s1227_s12, %s1223_s13 }
 0x2e6   : > { %p1225_p7 = pnand %p1224_p5, %p1811_p6 }
 0x2e7   : > { %p1230_p2 = por %p1229_p10, %p1228_p8 }
 0x2e8   : > { %p1226_p4 = pneg %p1225_p7 }
 0x2ea   : > { %p1231_p0 = pnand %p1230_p2, %p1226_p4 }
 0x34f   : > { %v724_v63 = vpop.permute.xlu0 %723 }
 0x350   : > { %vm725_vm0 = vcmp.eq.s32.totalorder %v724_v63, 1 }
 0x351   : > { %v726_v0 = vsel %vm725_vm0, %v1391_v48, 0.0  ;;  %v728_v1 = vsel %vm725_vm0, %v1387_v47, 0.0 }
 0x352   : > { %727 = vst [vmem:[%s270_s28] sm:$0xff] %v726_v0 }
 0x353   : > { %729 = vst [vmem:[%s277_s14] sm:$0xff] %v728_v1 }
 0x354   : > { %1234 = shalt.err (!%p1231_p0)
}
 0x355   : > { %1023 = dma.vmem_to_hbm [thread:$0]  (%p1811_p6), %s755_s30, 128, %s757_s22, %s731_s19  }
 0x356   : > { %s736_s10 = scalar_lea.sflag [#allocation10], %s735_s20  ;;  %s1249_s27 = sshra.s32 %s772_s15, 4  ;;  %s1250_s27 = int_to_ptr.hbm [resolvable:$true] %s1249_s27 }
 0x357   : > { %s1251_s28 = scalar_lea.hbm %s1250_s27, 8  ;;  %s1255_s24 = scalar_lea.hbm %s1790_s5, 16 }
 0x358   : > { %p1252_p1 = scmp.ne.s32.totalorder %s1250_s27, %s1251_s28  ;;  %p1256_p11 = scmp.lt.s32.totalorder %s1250_s27, %s1790_s5 }
 0x359   : > { %p1257_p13 = scmp.lt.s32.totalorder %s1255_s24, %s1251_s28 }
 0x35a   : > { %p1253_p9 = pnand %p1252_p1, %p1811_p6 }
 0x35b   : > { %p1258_p3 = por %p1257_p13, %p1256_p11 }
 0x35c   : > { %p1254_p12 = pneg %p1253_p9 }
 0x35e   : > { %p1259_p5 = pnand %p1258_p3, %p1254_p12 }
 0x360   : > { %1262 = shalt.err (!%p1259_p5)
}
 0x361   : > { %s1812_s9 = sld [smem:[#allocation17_spill]]  ;;  %s1277_s30 = sshra.s32 %s787_s2, 4  ;;  %s1278_s30 = int_to_ptr.hbm [resolvable:$true] %s1277_s30 }
 0x362   : > { %s1279_s22 = scalar_lea.hbm %s1278_s30, 8  ;;  %s1283_s12 = scalar_lea.hbm %s1791_s6, 16 }
 0x363   : > { %p1280_p7 = scmp.ne.s32.totalorder %s1278_s30, %s1279_s22  ;;  %p1284_p10 = scmp.lt.s32.totalorder %s1278_s30, %s1791_s6 }
 0x364   : > { %p1285_p2 = scmp.lt.s32.totalorder %s1283_s12, %s1279_s22 }
 0x365   : > { %p1281_p4 = pnand %p1280_p7, %p1811_p6 }
 0x366   : > { %p1286_p0 = por %p1285_p2, %p1284_p10 }
 0x367   : > { %s1813_s20 = int_to_ptr.vmem [resolvable:$true] %s1812_s9  ;;  %p1282_p8 = pneg %p1281_p4 }
 0x368   : > { %1024 = dma.vmem_to_hbm [thread:$0]  (%p1811_p6), %s1813_s20, 128, %s772_s15, %s736_s10  }
 0x369   : > { %p1287_p1 = pnand %p1286_p0, %p1282_p8 }
 0x36b   : > { %1290 = shalt.err (!%p1287_p1)
}
 0x36c   : > { %1025 = dma.vmem_to_hbm [thread:$0]  (%p1811_p6), %s785_s25, 128, %s787_s2, %s736_s10  }
 0x36d PF: > { %s798_s15 = sand.u32 1, %s1351_s0   ;;  %p1814_p9 = scmp.ne.s32.totalorder %s1802_s18, 0 }
 0x36e   : > { %p1815_p12 = scmp.ge.s32.totalorder %s1371_s8, 2  ;;  %s799_s28 = scalar_lea.sflag [#allocation7], %s798_s15 }
 0x370   : > { %p1034_p11 = pnand %p1815_p12, %p1814_p9 }
 0x372   : > { %p1035_p13 = pneg %p1034_p11 }
 0x374   : > { %1342 = dma.done.wait (%p1035_p13), %s799_s28, 128  }
 0x375   : > { %1344 = vsyncadd (%p1035_p13), %s799_s28, 4294967168  ;;  %s1816_s14 = sadd.s32 4294967294, %s1371_s8  }
 0x376   : > { %s808_s16 = sand.u32 1, %s1816_s14  }
 0x377   : > { %s809_s23 = scalar_lea.sflag [#allocation10], %s808_s16 }
 0x378   : > { %1346 = dma.done.wait (%p1035_p13), %s809_s23, 256  }
 0x379   : > { %1348 = vsyncadd (%p1035_p13), %s809_s23, 4294967040  ;;  %s39_s8 = sadd.s32 1, %s1371_s8   ;;  %s1817_s18 = sld [smem:[#allocation16_spill]] }
 0x37a   : > { %p36_p6 = scmp.ge.s32.totalorder %s39_s8, 4   ;;  %s1818_s0 = smov %s1355_s29 }
 0x37b   : > { %s1819_s29 = smov %s1359_s1  ;;  %s1820_s1 = smov %s1508_s17 }
 0x37c   : > { %s1821_s30 = smov %s1367_s7  ;;  %38 = sbr.rel (!%p36_p6) target bundleno = 16 (0x10), region = 127 }
 0x37f   : > { %s1822_s7 = smov %s1817_s18 }
 0x381   :  { %825 = vsyncpa [#allocation6], 1 }
 0x382   :  { %827 = vsyncpa [#allocation6 + $0x1], 1 }
 0x383   :  { %828 = vsyncpa [#allocation7], 1 }
 0x384   :  { %830 = vsyncpa [#allocation7 + $0x1], 1 }
 0x385   :  { %831 = vsyncpa [#allocation10], 1 }
 0x386   :  { %833 = vsyncpa [#allocation10 + $0x1], 1 }

</bundles_post_ra>
